<compile_context>
chip_gen: v5e
topology: v5e:2x2
jax: 0.10.0
libtpu: 0.0.40
codegen_flags: <defaults>
</compile_context>

<pallas_src>
import jax
import jax.numpy as jnp
from jax.experimental import pallas as pl
from jax.experimental.pallas import tpu as pltpu

HIDDEN_DIM = 500   # logical hidden width from the PyTorch module
HIDDEN_PAD = 512   # padded: 4x128 lanes (v5e MXU) / 2x256 (v6e/v7x MXU); zero-pad is inert


def policy_kernel(x_ref, w1_ref, b1_ref, w2_ref, b2_ref, o_ref):
    # ---- Linear 1 + ReLU : bf16 MXU inputs, f32 accumulation, f32 elementwise ----
    x = x_ref[...].astype(jnp.bfloat16)
    h = jnp.dot(x, w1_ref[...], preferred_element_type=jnp.float32)
    h = jnp.maximum(h + b1_ref[...], 0.0)          # b1 (1, H_pad) broadcasts over batch

    # ---- Linear 2 ----
    logits = jnp.dot(h.astype(jnp.bfloat16), w2_ref[...],
                     preferred_element_type=jnp.float32)
    logits = logits + b2_ref[...]                  # b2 (1, out_dim)

    # ---- Softmax over last axis (numerically stable); reciprocal on the EUP ----
    m = jnp.max(logits, axis=-1, keepdims=True)
    e = jnp.exp(logits - m)
    denom = jnp.sum(e, axis=-1, keepdims=True)
    o_ref[...] = (e * pl.reciprocal(denom, approx=True)).astype(o_ref.dtype)


def policy_network_forward(x, w1, b1, w2, b2, *, block_b=8):
    """x: (B, in_dim) f32. w1: (in_dim, H_pad) bf16. b1: (1, H_pad) f32.
    w2: (H_pad, out_dim) bf16. b2: (1, out_dim) f32. Returns (B, out_dim) f32."""
    B, in_dim = x.shape
    h_pad, out_dim = w2.shape

    # Pad batch to a multiple of the batch tile (min sublane tile = 8); slice off after.
    B_pad = ((B + block_b - 1) // block_b) * block_b
    if B_pad != B:
        x = jnp.pad(x, ((0, B_pad - B), (0, 0)))
    grid = (B_pad // block_b,)

    out = pl.pallas_call(
        policy_kernel,
        out_shape=jax.ShapeDtypeStruct((B_pad, out_dim), jnp.float32),
        grid=grid,
        in_specs=[
            pl.BlockSpec((block_b, in_dim), lambda i: (i, 0)),   # per-tile batch slice
            pl.BlockSpec((in_dim, h_pad),  lambda i: (0, 0)),    # weights stay VMEM-resident
            pl.BlockSpec((1, h_pad),       lambda i: (0, 0)),
            pl.BlockSpec((h_pad, out_dim), lambda i: (0, 0)),
            pl.BlockSpec((1, out_dim),     lambda i: (0, 0)),
        ],
        out_specs=pl.BlockSpec((block_b, out_dim), lambda i: (i, 0)),
        compiler_params=pltpu.CompilerParams(
            dimension_semantics=("parallel",)),   # batch tiles independent -> v7x dual-TC
    )(x, w1, b1, w2, b2)
    return out[:B]


def init_params(key, input_dim, output_dim):
    """PyTorch nn.Linear-style init U(-1/sqrt(fan_in), 1/sqrt(fan_in)); weights stored
    as [in, out]. Returns kernel-ready params (hidden zero-padded to 512, weights bf16)
    plus the unpadded f32 originals for reference checking."""
    k1, k2, k3, k4 = jax.random.split(key, 4)
    lim1 = 1.0 / jnp.sqrt(float(input_dim))
    lim2 = 1.0 / jnp.sqrt(float(HIDDEN_DIM))
    w1 = jax.random.uniform(k1, (input_dim, HIDDEN_DIM), jnp.float32, -lim1, lim1)
    b1 = jax.random.uniform(k2, (1, HIDDEN_DIM), jnp.float32, -lim1, lim1)
    w2 = jax.random.uniform(k3, (HIDDEN_DIM, output_dim), jnp.float32, -lim2, lim2)
    b2 = jax.random.uniform(k4, (1, output_dim), jnp.float32, -lim2, lim2)

    pad = HIDDEN_PAD - HIDDEN_DIM
    w1p = jnp.pad(w1, ((0, 0), (0, pad))).astype(jnp.bfloat16)  # zero cols -> inert
    b1p = jnp.pad(b1, ((0, 0), (0, pad)))                       # exact-zero padded biases
    w2p = jnp.pad(w2, ((0, pad), (0, 0))).astype(jnp.bfloat16)  # zero rows -> inert
    return (w1p, b1p, w2p, b2), (w1, b1, w2, b2)


def _ref_quantized(x, w1p, b1p, w2p, b2):
    """Pure-JAX mirror of the kernel's numerics (bf16 matmul inputs, f32 accumulate)."""
    xb = x.astype(jnp.bfloat16).astype(jnp.float32)
    h = jnp.maximum(xb @ w1p.astype(jnp.float32) + b1p, 0.0)
    hb = h.astype(jnp.bfloat16).astype(jnp.float32)
    logits = hb @ w2p.astype(jnp.float32) + b2
    return jax.nn.softmax(logits, axis=-1)


if __name__ == "__main__":
    INPUT_DIM = 32
    OUTPUT_DIM = 16
    BATCH = 16        # 2 batch tiles of 8 -> exercises the parallel grid axis
    BLOCK_B = 8

    key = jax.random.PRNGKey(0)
    kx, kp = jax.random.split(key)
    x = jax.random.normal(kx, (BATCH, INPUT_DIM), jnp.float32)
    (w1p, b1p, w2p, b2), (w1, b1, w2, _) = init_params(kp, INPUT_DIM, OUTPUT_DIM)

    out = policy_network_forward(x, w1p, b1p, w2p, b2, block_b=BLOCK_B)
    out = jax.block_until_ready(out)
    assert out.shape == (BATCH, OUTPUT_DIM)

    # Tight check vs. a reference using identical quantization (isolates kernel correctness;
    # slack covers the approx reciprocal, ~1e-3 relative on probabilities <= 1).
    ref_q = _ref_quantized(x, w1p, b1p, w2p, b2)
    assert jnp.allclose(out, ref_q, atol=5e-3, rtol=5e-3)
    assert jnp.allclose(jnp.sum(out, axis=-1), 1.0, atol=5e-3)

    # Loose semantic check vs. the exact f32, hidden=500 module math.
    ref_full = jax.nn.softmax(jnp.maximum(x @ w1 + b1, 0.0) @ w2 + b2, axis=-1)
    assert jnp.allclose(out, ref_full, atol=5e-2)

    print("KERNEL_OK")
</pallas_src>

<mosaic_0001>
module attributes {stable_mosaic.version = 11 : i64} {
  func.func @policy_kernel(%arg0: i32, %arg1: memref<8x32xf32, #tpu.memory_space<vmem>>, %arg2: memref<32x512xbf16, #tpu.memory_space<vmem>>, %arg3: memref<1x512xf32, #tpu.memory_space<vmem>>, %arg4: memref<512x16xbf16, #tpu.memory_space<vmem>>, %arg5: memref<1x16xf32, #tpu.memory_space<vmem>>, %arg6: memref<8x16xf32, #tpu.memory_space<vmem>>) attributes {dimension_semantics = [#tpu.dimension_semantics<parallel>], iteration_bounds = array<i64: 2>, scalar_prefetch = 0 : i64, scratch_operands = 0 : i64, tpu.core_type = #tpu.core_type<tc>, window_params = [{transform_indices = @transform_0, window_bounds = array<i64: 8, 32>}, {pipeline_mode = #tpu.pipeline_mode<synchronous>, transform_indices = @transform_1, window_bounds = array<i64: 32, 512>}, {pipeline_mode = #tpu.pipeline_mode<synchronous>, transform_indices = @transform_2, window_bounds = array<i64: 1, 512>}, {pipeline_mode = #tpu.pipeline_mode<synchronous>, transform_indices = @transform_3, window_bounds = array<i64: 512, 16>}, {pipeline_mode = #tpu.pipeline_mode<synchronous>, transform_indices = @transform_4, window_bounds = array<i64: 1, 16>}, {transform_indices = @transform_5, window_bounds = array<i64: 8, 16>}]} {
    %c0 = arith.constant 0 : index
    %c0_0 = arith.constant 0 : index
    %0 = vector.load %arg1[%c0, %c0_0] : memref<8x32xf32, #tpu.memory_space<vmem>>, vector<8x32xf32>
    %1 = arith.truncf %0 : vector<8x32xf32> to vector<8x32xbf16>
    %c0_1 = arith.constant 0 : index
    %c0_2 = arith.constant 0 : index
    %2 = vector.load %arg2[%c0_1, %c0_2] : memref<32x512xbf16, #tpu.memory_space<vmem>>, vector<32x512xbf16>
    %cst = arith.constant dense<0.000000e+00> : vector<8x512xf32>
    %3 = tpu.matmul %1, %2, %cst {dimension_numbers = #tpu.dot_dimension_numbers<[1], [0], [0], [1], [0, 0, 1, 1], [], []>} : vector<8x32xbf16>, vector<32x512xbf16>, vector<8x512xf32> -> vector<8x512xf32>
    %c0_3 = arith.constant 0 : index
    %c0_4 = arith.constant 0 : index
    %4 = vector.load %arg3[%c0_3, %c0_4] : memref<1x512xf32, #tpu.memory_space<vmem>>, vector<1x512xf32>
    %5 = vector.broadcast %4 : vector<1x512xf32> to vector<8x512xf32>
    %6 = arith.addf %3, %5 : vector<8x512xf32>
    %cst_5 = arith.constant 0.000000e+00 : f32
    %7 = vector.broadcast %cst_5 : f32 to vector<8x512xf32>
    %8 = arith.maximumf %6, %7 : vector<8x512xf32>
    %9 = arith.truncf %8 : vector<8x512xf32> to vector<8x512xbf16>
    %c0_6 = arith.constant 0 : index
    %c0_7 = arith.constant 0 : index
    %10 = vector.load %arg4[%c0_6, %c0_7] : memref<512x16xbf16, #tpu.memory_space<vmem>>, vector<512x16xbf16>
    %cst_8 = arith.constant dense<0.000000e+00> : vector<8x16xf32>
    %11 = tpu.matmul %9, %10, %cst_8 {dimension_numbers = #tpu.dot_dimension_numbers<[1], [0], [0], [1], [0, 0, 1, 1], [], []>} : vector<8x512xbf16>, vector<512x16xbf16>, vector<8x16xf32> -> vector<8x16xf32>
    %c0_9 = arith.constant 0 : index
    %c0_10 = arith.constant 0 : index
    %12 = vector.load %arg5[%c0_9, %c0_10] : memref<1x16xf32, #tpu.memory_space<vmem>>, vector<1x16xf32>
    %13 = vector.broadcast %12 : vector<1x16xf32> to vector<8x16xf32>
    %14 = arith.addf %11, %13 : vector<8x16xf32>
    %cst_11 = arith.constant dense<0xFF800000> : vector<8xf32>
    %15 = vector.multi_reduction <maximumf>, %14, %cst_11 [1] : vector<8x16xf32> to vector<8xf32>
    %16 = vector.shape_cast %15 : vector<8xf32> to vector<8x1xf32>
    %17 = vector.broadcast %16 : vector<8x1xf32> to vector<8x16xf32>
    %18 = arith.subf %14, %17 : vector<8x16xf32>
    %19 = math.exp %18 : vector<8x16xf32>
    %cst_12 = arith.constant dense<0.000000e+00> : vector<8xf32>
    %20 = vector.multi_reduction <add>, %19, %cst_12 [1] : vector<8x16xf32> to vector<8xf32>
    %21 = vector.shape_cast %20 : vector<8xf32> to vector<8x1xf32>
    %22 = tpu.reciprocal %21 {approx = true} : vector<8x1xf32> -> vector<8x1xf32>
    %23 = vector.broadcast %22 : vector<8x1xf32> to vector<8x16xf32>
    %24 = arith.mulf %19, %23 : vector<8x16xf32>
    %c0_13 = arith.constant 0 : index
    %c0_14 = arith.constant 0 : index
    %25 = vector.load %arg6[%c0_13, %c0_14] : memref<8x16xf32, #tpu.memory_space<vmem>>, vector<8x16xf32>
    tpu.vector_store %arg6[%c0_13, %c0_14], %24 {strides = array<i32>} : memref<8x16xf32, #tpu.memory_space<vmem>>, vector<8x16xf32>,
    return
  }
  func.func @transform_0(%arg0: i32) -> (i32, i32) {
    %c0_i32 = arith.constant 0 : i32
    %c0_i32_0 = arith.constant 0 : i32
    return %arg0, %c0_i32 : i32, i32
  }
  func.func @transform_1(%arg0: i32) -> (i32, i32) {
    %c0_i32 = arith.constant 0 : i32
    %c0_i32_0 = arith.constant 0 : i32
    %c0_i32_1 = arith.constant 0 : i32
    return %c0_i32, %c0_i32_0 : i32, i32
  }
  func.func @transform_2(%arg0: i32) -> (i32, i32) {
    %c0_i32 = arith.constant 0 : i32
    %c0_i32_0 = arith.constant 0 : i32
    %c0_i32_1 = arith.constant 0 : i32
    return %c0_i32, %c0_i32_0 : i32, i32
  }
  func.func @transform_3(%arg0: i32) -> (i32, i32) {
    %c0_i32 = arith.constant 0 : i32
    %c0_i32_0 = arith.constant 0 : i32
    %c0_i32_1 = arith.constant 0 : i32
    return %c0_i32, %c0_i32_0 : i32, i32
  }
  func.func @transform_4(%arg0: i32) -> (i32, i32) {
    %c0_i32 = arith.constant 0 : i32
    %c0_i32_0 = arith.constant 0 : i32
    %c0_i32_1 = arith.constant 0 : i32
    return %c0_i32, %c0_i32_0 : i32, i32
  }
  func.func @transform_5(%arg0: i32) -> (i32, i32) {
    %c0_i32 = arith.constant 0 : i32
    %c0_i32_0 = arith.constant 0 : i32
    return %arg0, %c0_i32 : i32, i32
  }
}

</mosaic_0001>

<bundles_post_ra>
// kernel: tpu_custom_call.1
= control target key start
LH: loop header
LB: loop body
LE: loop exit
PB: predicated region body
PF: predicated region fallthrough
CT: control target
= control target key end

     0   :  { %10 = vsyncpa [#allocation3], 0  ;;  %s1335_s0 = inlined_call_operand.vmem [shape: f32[16,32], index: 0, kind: input, shape index: {}]   ;;  %s1336_s1 = inlined_call_operand.vmem [shape: bf16[32,512], index: 1, kind: input, shape index: {}]   ;;  %s1337_s2 = inlined_call_operand.vmem [shape: f32[1,512], index: 2, kind: input, shape index: {}]   ;;  %s1338_s3 = inlined_call_operand.vmem [shape: bf16[512,16], index: 3, kind: input, shape index: {}]   ;;  %s1339_s4 = inlined_call_operand.vmem [shape: f32[1,16], index: 4, kind: input, shape index: {}]   ;;  %s1340_s5 = inlined_call_operand.hbm [shape: f32[16,16], index: 5, kind: output, shape index: {}]  }
   0x1   :  { %12 = vsyncpa [#allocation3 + $0x1], 0  ;;  %s1097_s18 = smov 0   ;;  %s1099_s19 = smov 0  }
   0x2   :  { %s1101_s20 = smov 0   ;;  %s1103_s21 = smov 0  }
   0x3 LB: > { %s1118_s22 = sadd.s32 4294967295, %s1065_s21   ;;  %s745_s23 = sadd.s32 4294967294, %s1065_s21   ;;  %s1065_s21 = sphi %s1103_s21, %s1346_s21   ;;  %s1061_s20 = sphi %s1101_s20, %s1345_s20   ;;  %s1057_s19 = sphi %s1099_s19, %s1344_s19   ;;  %s1053_s18 = sphi %s1097_s18, %s1343_s18  }
   0x4   : > { %s1122_s24 = sadd.s32 1, %s1065_s21   ;;  %s135_s25 = sadd.s32 1, %s1061_s20 }
   0x5   : > { %s132_s26 = ssub.s32 %s1065_s21, %s1122_s24  ;;  %p145_p0 = scmp.ne.s32.totalorder %s1061_s20, %s1057_s19 }
   0x6   : > { %p133_p1 = scmp.eq.s32.totalorder %s132_s26, 0  ;;  %p146_p2 = scmp.eq.s32.totalorder %s1118_s22, 1 }
   0x7   : > { %p151_p3 = scmp.ne.s32.totalorder %s1057_s19, %s1053_s18  ;;  %p152_p4 = scmp.eq.s32.totalorder %s745_s23, 1 }
   0x8   : > { %s1133_s27 = scalar_select %p133_p1, %s1061_s20, %s135_s25  }
   0x9   : > { %p1135_p5 = por %p146_p2, %p145_p0  ;;  %p1139_p6 = por %p152_p4, %p151_p3 }
   0xa   : > { %p748_p7 = scmp.ge.s32.totalorder %s1065_s21, 1  ;;  %p189_p8 = scmp.lt.s32.totalorder %s1065_s21, 3 }
   0xc   : > { %p190_p9 = pnand %p748_p7, %p189_p8 }
   0xd   : > { %p216_p10 = scmp.lt.s32.totalorder (!%p190_p9), %s1118_s22, 1  ;;  %s916_s16 = sshll.u32 (!%p190_p9), %s1118_s22, 3 }
   0xe   : > { %193 = sbr.rel (%p190_p9) target bundleno = 564 (0x234), region = 40 }
  0x13   : > { %v769_v0 = vld [vmem:[%s1336_s1 + $0x20] sm:$0xf]  ;;  %v925_v1 = vld [vmem:[%s1336_s1 + $0x2c] sm:$0xf0]  ;;  %v777_v2 = vld [vmem:[%s1336_s1 + $0x28] sm:$0xf] }
  0x14   : > { %v770_v3 = vor.u32 %v925_v1, %v769_v0  ;;  %v926_v4 = vld [vmem:[%s1336_s1 + $0x34] sm:$0xf0]  ;;  %v924_v5 = vld [vmem:[%s1336_s1 + $0x2c] sm:$0xf]  ;;  %v779_v6 = vld [vmem:[%s1336_s1 + $0x38] sm:$0xf0] }
  0x15   : > { %v778_v7 = vor.u32 %v926_v4, %v777_v2  ;;  %v782_v8 = vor.u32 %v924_v5, %v779_v6  ;;  %v923_v9 = vld [vmem:[%s1336_s1 + $0x24] sm:$0xf]  ;;  %v771_v10 = vld [vmem:[%s1336_s1 + $0x30] sm:$0xf0]  ;;  %v753_v11 = vld [vmem:[%s1336_s1] sm:$0xf] }
  0x16   : > { %291 = vmatpush.bf16.msra.mxu0 %v770_v3  ;;  %v774_v12 = vor.u32 %v923_v9, %v771_v10  ;;  %v921_v13 = vld [vmem:[%s1336_s1 + $0xc] sm:$0xf0]  ;;  %v761_v14 = vld [vmem:[%s1336_s1 + $0x8] sm:$0xf]  ;;  %v922_v15 = vld [vmem:[%s1336_s1 + $0x14] sm:$0xf0] }
  0x17   : > { %317 = vmatpush.bf16.msra.mxu2 %v778_v7  ;;  %330 = vmatpush.bf16.msra.mxu3 %v782_v8  ;;  %v754_v16 = vor.u32 %v921_v13, %v753_v11  ;;  %v762_v17 = vor.u32 %v922_v15, %v761_v14  ;;  %v920_v18 = vld [vmem:[%s1336_s1 + $0xc] sm:$0xf]  ;;  %v763_v19 = vld [vmem:[%s1336_s1 + $0x18] sm:$0xf0]  ;;  %v919_v20 = vld [vmem:[%s1336_s1 + $0x4] sm:$0xf] }
  0x18   : > { %304 = vmatpush.bf16.msra.mxu1 %v774_v12  ;;  %v766_v21 = vor.u32 %v920_v18, %v763_v19  ;;  %v755_v22 = vld [vmem:[%s1336_s1 + $0x10] sm:$0xf0]  ;;  %v934_v23 = vld [vmem:[%s1338_s3 + $0x38] sm:$0xff]  ;;  %s217_s11 = scalar_select %p216_p10, %s1118_s22, 1  ;;  %vm281_vm0 = vcmask 261120   ;;  %v932_v33 = vld [vmem:[%s1338_s3 + $0x28] sm:$0xff] }
  0x19   : > { %v758_v24 = vor.u32 %v919_v20, %v755_v22  ;;  %v942_v25 = vld [vmem:[%s1338_s3 + $0x78] sm:$0xff]  ;;  %v933_v28 = vld [vmem:[%s1338_s3 + $0x30] sm:$0xff]  ;;  %v940_v35 = vld [vmem:[%s1338_s3 + $0x68] sm:$0xff]  ;;  %vm657_vm1 = vcmask 130048  }
  0x1a   : > { %v950_v26 = vld [vmem:[%s1338_s3 + $0xb8] sm:$0xff]  ;;  %292 = vmatpush.bf16.msra.mxu0 %v754_v16  ;;  %s750_s14 = sshll.u32 %s217_s11, 3  ;;  %v941_v31 = vld [vmem:[%s1338_s3 + $0x70] sm:$0xff]  ;;  %v948_v36 = vld [vmem:[%s1338_s3 + $0xa8] sm:$0xff]  ;;  %s1023_s11 = scalar_lea.hbm %s1340_s5, 16 }
  0x1b   : > { %v958_v27 = vld [vmem:[%s1338_s3 + $0xf8] sm:$0xff]  ;;  %318 = vmatpush.bf16.msra.mxu2 %v762_v17  ;;  %331 = vmatpush.bf16.msra.mxu3 %v766_v21  ;;  %s219_s25 = scalar_lea.vmem %s1335_s0, %s750_s14  ;;  %v949_v32 = vld [vmem:[%s1338_s3 + $0xb0] sm:$0xff]  ;;  %v931_v37 = vld [vmem:[%s1338_s3 + $0x20] sm:$0xff]  ;;  %s213_s14 = sand.u32 1, %s1057_s19  }
  0x1c   : > { %305 = vmatpush.bf16.msra.mxu1 %v758_v24  ;;  %v221_v29 = vld [vmem:[%s219_s25] sm:$0xff]  ;;  %v957_v34 = vld [vmem:[%s1338_s3 + $0xf0] sm:$0xff]  ;;  %v956_v38 = vld [vmem:[%s1338_s3 + $0xe8] sm:$0xff]  ;;  %s749_s15 = sshll.u32 %s213_s14, 3  ;;  %s681_s25 = scalar_lea.hbm %s1340_s5, %s916_s16 }
  0x1d   : > { %v222_v30 = vpack.c.bf16 %v221_v29, %v221_v29  ;;  %v939_v39 = vld [vmem:[%s1338_s3 + $0x60] sm:$0xff]  ;;  %v930_v41 = vld [vmem:[%s1338_s3 + $0x18] sm:$0xff]  ;;  %v929_v45 = vld [vmem:[%s1338_s3 + $0x10] sm:$0xff]  ;;  %s215_s26 = scalar_lea.vmem [#allocation2], %s749_s15  ;;  %s685_s6 = sshll.u32 %s681_s25, 4  ;;  %s686_s6 = int_to_ptr.hbm [resolvable:$true] %s685_s6 }
  0x1e   : > { %605 = vmatpush.bf16.msrb.mxu0 %v934_v23  ;;  %v947_v40 = vld [vmem:[%s1338_s3 + $0xa0] sm:$0xff]  ;;  %v938_v43 = vld [vmem:[%s1338_s3 + $0x58] sm:$0xff]  ;;  %v937_v47 = vld [vmem:[%s1338_s3 + $0x50] sm:$0xff]  ;;  %s683_s30 = sshll.u32 %s215_s26, 4  ;;  %s671_s7 = scalar_lea.sflag [#allocation3], %s213_s14  ;;  %s684_s30 = int_to_ptr.vmem [resolvable:$true] %s683_s30 }
  0x1f   : > { %631 = vmatpush.bf16.msrb.mxu2 %v950_v26  ;;  %644 = vmatpush.bf16.msrb.mxu3 %v958_v27  ;;  %v955_v42 = vld [vmem:[%s1338_s3 + $0xe0] sm:$0xff]  ;;  %v946_v44 = vld [vmem:[%s1338_s3 + $0x98] sm:$0xff]  ;;  %v928_v48 = vld [vmem:[%s1338_s3 + $0x8] sm:$0xff]  ;;  %s1017_s8 = sshra.s32 %s686_s6, 4  ;;  %s1018_s8 = int_to_ptr.hbm [resolvable:$true] %s1017_s8 }
  0x20   : > { %618 = vmatpush.bf16.msrb.mxu1 %v942_v25  ;;  %783 = vmatmul.msk.bf16.vlgmr.msra.gmra.mxu0 %vm281_vm0, %v222_v30  ;;  %v954_v46 = vld [vmem:[%s1338_s3 + $0xd8] sm:$0xff]  ;;  %v936_v49 = vld [vmem:[%s1338_s3 + $0x48] sm:$0xff]  ;;  %v945_v50 = vld [vmem:[%s1338_s3 + $0x90] sm:$0xff]  ;;  %s1019_s22 = scalar_lea.hbm %s1018_s8, 8  ;;  %p1024_p0 = scmp.lt.s32.totalorder %s1018_s8, %s1340_s5 }
  0x21   : > { %785 = vmatmul.msk.bf16.vlgmr.msra.gmra.mxu2 %vm281_vm0, %v222_v30  ;;  %786 = vmatmul.msk.bf16.vlgmr.msra.gmra.mxu3 %vm281_vm0, %v222_v30  ;;  %v953_v51 = vld [vmem:[%s1338_s3 + $0xd0] sm:$0xff]  ;;  %v927_v52 = vld [vmem:[%s1338_s3] sm:$0xff]  ;;  %v944_v54 = vld [vmem:[%s1338_s3 + $0x88] sm:$0xff]  ;;  %p1020_p11 = scmp.ne.s32.totalorder %s1018_s8, %s1019_s22  ;;  %p1025_p1 = scmp.lt.s32.totalorder %s1023_s11, %s1019_s22 }
  0x22   : > { %606 = vmatpush.bf16.msrb.mxu0 %v933_v28  ;;  %784 = vmatmul.msk.bf16.vlgmr.msra.gmra.mxu1 %vm281_vm0, %v222_v30  ;;  %v935_v53 = vld [vmem:[%s1338_s3 + $0x40] sm:$0xff]  ;;  %v952_v55 = vld [vmem:[%s1338_s3 + $0xc8] sm:$0xff] }
  0x23   : > { %632 = vmatpush.bf16.msrb.mxu2 %v949_v32  ;;  %645 = vmatpush.bf16.msrb.mxu3 %v957_v34  ;;  %v943_v56 = vld [vmem:[%s1338_s3 + $0x80] sm:$0xff]  ;;  %p1021_p12 = pnand %p1020_p11, %p1135_p5  ;;  %p1026_p2 = por %p1025_p1, %p1024_p0 }
  0x24   : > { %619 = vmatpush.bf16.msrb.mxu1 %v941_v31  ;;  %v951_v57 = vld [vmem:[%s1338_s3 + $0xc0] sm:$0xff] }
  0x25   : > { %v231_v58 = vld [vmem:[%s1337_s2] sm:$0xf]  ;;  %p1022_p13 = pneg %p1021_p12 }
  0x26   : > { %607 = vmatpush.bf16.msrb.mxu0 %v932_v33  ;;  %v233_v59 = vperm.slane %v231_v58, 0  ;;  %v234_v60 = vperm.slane %v231_v58, 1  ;;  %v235_v2 = vperm.slane %v231_v58, 2  ;;  %v236_v4 = vperm.slane %v231_v58, 3  ;;  %v998_v20 = vld [vmem:[%s1339_s4] ss:$0 sm:$0xff] }
  0x27   : > { %633 = vmatpush.bf16.msrb.mxu2 %v948_v36  ;;  %646 = vmatpush.bf16.msrb.mxu3 %v956_v38  ;;  %p1027_p3 = pnand %p1026_p2, %p1022_p13 }
  0x28   : > { %620 = vmatpush.bf16.msrb.mxu1 %v940_v35 }
  0x2a   : > { %608 = vmatpush.bf16.msrb.mxu0 %v931_v37 }
  0x2b   : > { %634 = vmatpush.bf16.msrb.mxu2 %v947_v40  ;;  %647 = vmatpush.bf16.msrb.mxu3 %v955_v42 }
  0x2c   : > { %621 = vmatpush.bf16.msrb.mxu1 %v939_v39 }
  0x2e   : > { %609 = vmatpush.bf16.msrb.mxu0 %v930_v41 }
  0x2f   : > { %635 = vmatpush.bf16.msrb.mxu2 %v946_v44  ;;  %648 = vmatpush.bf16.msrb.mxu3 %v954_v46 }
  0x30   : > { %622 = vmatpush.bf16.msrb.mxu1 %v938_v43 }
  0x32   : > { %610 = vmatpush.bf16.msrb.mxu0 %v929_v45 }
  0x33   : > { %636 = vmatpush.bf16.msrb.mxu2 %v945_v50  ;;  %649 = vmatpush.bf16.msrb.mxu3 %v953_v51 }
  0x34   : > { %623 = vmatpush.bf16.msrb.mxu1 %v937_v47 }
  0x36   : > { %611 = vmatpush.bf16.msrb.mxu0 %v928_v48 }
  0x37   : > { %637 = vmatpush.bf16.msrb.mxu2 %v944_v54  ;;  %650 = vmatpush.bf16.msrb.mxu3 %v952_v55 }
  0x38   : > { %624 = vmatpush.bf16.msrb.mxu1 %v936_v49 }
  0x3a   : > { %612 = vmatpush.bf16.msrb.mxu0 %v927_v52 }
  0x3b   : > { %638 = vmatpush.bf16.msrb.mxu2 %v943_v56  ;;  %651 = vmatpush.bf16.msrb.mxu3 %v951_v57 }
  0x3c   : > { %625 = vmatpush.bf16.msrb.mxu1 %v935_v53 }
  0x9d   : > { %v294_v61 = vpop.f32.mrf.mxu0 }
  0x9e   : > { %v295_v62 = vadd.f32 %v294_v61, %v233_v59 }
  0x9f   : > { %v307_v63 = vpop.f32.mrf.mxu1 }
  0xa0   : > { %v308_v0 = vadd.f32 %v307_v63, %v234_v60  ;;  %v337_v1 = vmax.f32 %v295_v62, 0.0 }
  0xa2   : > { %v338_v3 = vmax.f32 %v308_v0, 0.0  ;;  %v341_v5 = vpack.c.bf16 %v337_v1, %v337_v1 }
  0xa4   : > { %v342_v6 = vpack.c.bf16 %v338_v3, %v338_v3  ;;  %v320_v7 = vpop.f32.mrf.mxu2  ;;  %v333_v9 = vpop.f32.mrf.mxu3  ;;  %613 = vmatmul.bf16.vlgmr.msrb.gmra.mxu0 %v341_v5 }
  0xa5   : > { %v321_v8 = vadd.f32 %v320_v7, %v235_v2  ;;  %v334_v10 = vadd.f32 %v333_v9, %v236_v4  ;;  %v296_v11 = vpop.f32.mrf.mxu0 }
  0xa6   : > { %626 = vmatmul.bf16.vlgmr.msrb.gmra.mxu1 %v342_v6 }
  0xa7   : > { %v339_v12 = vmax.f32 %v321_v8, 0.0  ;;  %v309_v13 = vpop.f32.mrf.mxu1  ;;  %v340_v14 = vmax.f32 %v334_v10, 0.0 }
  0xa9   : > { %v343_v15 = vpack.c.bf16 %v339_v12, %v339_v12  ;;  %v344_v16 = vpack.c.bf16 %v340_v14, %v340_v14 }
  0xab   : > { %639 = vmatmul.bf16.vlgmr.msrb.gmra.mxu2 %v343_v15  ;;  %652 = vmatmul.bf16.vlgmr.msrb.gmra.mxu3 %v344_v16 }
  0xac   : > { %v322_v17 = vpop.f32.mrf.mxu2  ;;  %v335_v18 = vpop.f32.mrf.mxu3 }
 0x121   : > { %v614_v19 = vpop.f32.mrf.mxu0 }
 0x122   : > { %v615_v22 = vadd.f32 %v998_v20, %v614_v19 }
 0x123   : > { %v627_v21 = vpop.f32.mrf.mxu1 }
 0x124   : > { %v628_v24 = vadd.f32 %v627_v21, %v615_v22 }
 0x129   : > { %v616_v23 = vpop.f32.mrf.mxu0 }
 0x12b   : > { %v629_v25 = vpop.f32.mrf.mxu1 }
 0x12e   : > { %v640_v26 = vpop.f32.mrf.mxu2  ;;  %v653_v28 = vpop.f32.mrf.mxu3 }
 0x12f   : > { %v641_v27 = vadd.f32 %v640_v26, %v628_v24 }
 0x131   : > { %v654_v29 = vadd.f32 %v653_v28, %v641_v27 }
 0x133   : > { %v658_v30 = vsel %vm657_vm1, %v654_v29, -inf }
 0x134   : > { %659 = vmax.xlane.f32.xlu0 %v658_v30 }
 0x136   : > { %v642_v31 = vpop.f32.mrf.mxu2  ;;  %v655_v32 = vpop.f32.mrf.mxu3 }
 0x1a7   : > { %v660_v33 = vpop.xlane.xlu0 %659 }
 0x1a8   : > { %v661_v34 = vsub.f32 %v654_v29, %v660_v33 }
 0x1aa   : > { %v662_v35 = vmul.f32 1.442695, %v661_v34 }
 0x1ac   : > { %999 = vpow2.f32 %v662_v35 }
 0x1b2   : > { %v1000_v36 = vpop.eup %999 }
 0x1b3   : > { %v664_v37 = vsel %vm657_vm1, %v1000_v36, 0.0 }
 0x1b4   : > { %665 = vadd.xlane.f32.xlu0 %v664_v37 }
 0x227   : > { %v666_v38 = vpop.xlane.xlu0 %665 }
 0x228   : > { %1001 = vrcp.f32 %v666_v38 }
 0x22e   : > { %v1002_v39 = vpop.eup %1001 }
 0x22f   : > { %v668_v40 = vmul.f32 %v1002_v39, %v1000_v36 }
 0x231   : > { %669 = vst.msk [vmem:[%s215_s26] sm:$0xff] %vm657_vm1, %v668_v40 }
 0x232   : > { %1030 = shalt.err (!%p1027_p3)
}
 0x233   : > { %959 = dma.vmem_to_hbm [thread:$0]  (%p1135_p5), %s684_s30, 128, %s686_s6, %s671_s7  }
 0x234 PF: > { %p965_p4 = scmp.ge.s32.totalorder %s1065_s21, 2  ;;  %s697_s14 = sand.u32 1, %s1053_s18  }
 0x235   : > { %s698_s15 = scalar_lea.sflag [#allocation3], %s697_s14 }
 0x236   : > { %p962_p7 = pnand %p965_p4, %p1139_p6 }
 0x238   : > { %p963_p8 = pneg %p962_p7 }
 0x23a   : > { %1048 = dma.done.wait (%p963_p8), %s698_s15, 128  }
 0x23b   : > { %1050 = vsyncadd (%p963_p8), %s698_s15, 4294967168  ;;  %p15_p9 = scmp.ge.s32.totalorder %s1122_s24, 4   ;;  %s1343_s18 = smov %s1057_s19 }
 0x23c   : > { %s1344_s19 = smov %s1061_s20  ;;  %s1345_s20 = smov %s1133_s27 }
 0x23d   : > { %s1346_s21 = smov %s1122_s24  ;;  %17 = sbr.rel (!%p15_p9) target bundleno = 3 (0x3), region = 75 }
 0x242   :  { %704 = vsyncpa [#allocation3], 1 }
 0x243   :  { %706 = vsyncpa [#allocation3 + $0x1], 1 }

</bundles_post_ra>
